<compile_context>
chip_gen: v7x
topology: tpu7x:2x2x1
jax: 0.10.0
libtpu: 0.0.40
codegen_flags: <defaults>
</compile_context>

<pallas_src>
import functools

import jax
import jax.numpy as jnp
import numpy as np
from jax.experimental import pallas as pl
from jax.experimental.pallas import tpu as pltpu

EPS = 1e-5


# ----------------------------- fused kernel ---------------------------------
def block_kernel(x_ref, m1_ref, m2_ref, p_ref,
                 g1_ref, b1_ref, g2_ref, b2_ref, out_ref,
                 *, N, H, W, C):
    R = N * H            # rows   (sublane axis)
    L = W * C            # lanes  (lane axis, multiple of 128 here)
    inv_count = 1.0 / float(N * H * W)

    x = x_ref[...]                                            # (R, L) f32

    # h coordinate of every row (row index = n*H + h), used for boundary masks.
    h_idx = jax.lax.broadcasted_iota(jnp.int32, (R, 1), 0) % H

    def conv3x3(act, m_ref):
        """3x3 conv, stride 1, zero padding; 3 MXU matmuls with banded weights."""
        acc = jnp.zeros((R, L), jnp.float32)
        for dh in (-1, 0, 1):
            if dh == 0:
                tap = act
            else:
                # shift rows by dh (XLU rotate) and zero rows that crossed an
                # image boundary (implicit zero padding along h).
                shifted = pltpu.roll(act, shift=(-dh) % R, axis=0)
                valid = jnp.logical_and(h_idx + dh >= 0, h_idx + dh < H)
                tap = jnp.where(valid, shifted, 0.0)
            acc = acc + jnp.dot(tap, m_ref[dh + 1],
                                preferred_element_type=jnp.float32)
        return acc

    def batchnorm(acc, g_ref, b_ref):
        """Training-mode BN: one-pass sum/sumsq stats + folded affine."""
        s = jnp.sum(acc, axis=0, keepdims=True)                # (1, L)
        sq = jnp.sum(acc * acc, axis=0, keepdims=True)         # (1, L)
        # fold the W groups of C lanes into per-channel sums, re-broadcast to
        # every lane with the same channel, in one small MXU matmul.
        s_c = jnp.dot(s, p_ref[...], preferred_element_type=jnp.float32)
        sq_c = jnp.dot(sq, p_ref[...], preferred_element_type=jnp.float32)
        mean = s_c * inv_count
        var = sq_c * inv_count - mean * mean                   # biased variance
        scale = g_ref[...] * jax.lax.rsqrt(var + EPS)          # (1, L)
        shift = b_ref[...] - mean * scale                      # (1, L)
        return acc * scale + shift

    # conv1 -> bn1 -> relu   (y stays in registers/VMEM, never hits HBM)
    y = jnp.maximum(batchnorm(conv3x3(x, m1_ref), g1_ref, b1_ref), 0.0)
    # conv2 -> bn2 -> +residual -> relu
    z = batchnorm(conv3x3(y, m2_ref), g2_ref, b2_ref)
    out_ref[...] = jnp.maximum(z + x, 0.0).astype(out_ref.dtype)


# ------------------------------ wrapper glue ---------------------------------
def make_banded_weights(w_hwio, W):
    """HWIO (3,3,Cin,Cout) conv weight -> (3, W*Cin, W*Cout) banded matrices.

    M[dh][w_in*Cin + ci, w_out*Cout + co] = w_hwio[dh, w_in - w_out + 1, ci, co]
    for |w_in - w_out| <= 1 (zero elsewhere), so `row_shifted_x @ M[dh]` is the
    1x3 horizontal convolution for kernel row dh with implicit zero padding.
    """
    kh, kw, cin, cout = w_hwio.shape
    mats = []
    for dh in range(kh):
        m = jnp.zeros((W, cin, W, cout), w_hwio.dtype)
        for dw in range(kw):
            off = 1 - dw                                  # w_out = w_in + off
            w_in = np.arange(max(0, -off), min(W, W - off))
            w_out = w_in + off
            m = m.at[w_in, :, w_out, :].set(w_hwio[dh, dw])
        mats.append(m.reshape(W * cin, W * cout))
    return jnp.stack(mats, axis=0)


def channel_group_matrix(W, C):
    """(W*C, W*C) matrix P with P[i, j] = 1 iff i % C == j % C.

    (row_sums @ P)[l] = per-channel total for channel l % C, broadcast over w.
    """
    lane = np.arange(W * C)
    return jnp.asarray((lane[:, None] % C) == (lane[None, :] % C), jnp.float32)


def block_forward_nchw(x_nchw, params):
    w1, g1, b1, w2, g2, b2 = params
    N, C, H, W = x_nchw.shape
    R, L = N * H, W * C

    # NCHW -> NHWC -> lane-dense (N*H, W*C) slab (layout plumbing, done once).
    x_flat = jnp.transpose(x_nchw, (0, 2, 3, 1)).reshape(R, L)

    m1 = make_banded_weights(w1, W)            # (3, L, L)
    m2 = make_banded_weights(w2, W)            # (3, L, L)
    p = channel_group_matrix(W, C)             # (L, L)
    g1t = jnp.tile(g1.reshape(1, C), (1, W))   # (1, L)
    b1t = jnp.tile(b1.reshape(1, C), (1, W))
    g2t = jnp.tile(g2.reshape(1, C), (1, W))
    b2t = jnp.tile(b2.reshape(1, C), (1, W))

    vmem = pl.BlockSpec(memory_space=pltpu.MemorySpace.VMEM)
    out_flat = pl.pallas_call(
        functools.partial(block_kernel, N=N, H=H, W=W, C=C),
        out_shape=jax.ShapeDtypeStruct((R, L), jnp.float32),
        in_specs=[vmem] * 8,
        out_specs=vmem,
    )(x_flat, m1, m2, p, g1t, b1t, g2t, b2t)

    return jnp.transpose(out_flat.reshape(N, H, W, C), (0, 3, 1, 2))


# ---------------- pure-JAX reference (sanity check only) ---------------------
def reference_nchw(x_nchw, params):
    w1, g1, b1, w2, g2, b2 = params
    x = jnp.transpose(x_nchw, (0, 2, 3, 1))

    def conv(v, w):
        return jax.lax.conv_general_dilated(
            v, w, window_strides=(1, 1), padding="SAME",
            dimension_numbers=("NHWC", "HWIO", "NHWC"))

    def bn(v, g, b):
        mean = jnp.mean(v, axis=(0, 1, 2), keepdims=True)
        var = jnp.mean((v - mean) ** 2, axis=(0, 1, 2), keepdims=True)
        return ((v - mean) * jax.lax.rsqrt(var + EPS)
                * g.reshape(1, 1, 1, -1) + b.reshape(1, 1, 1, -1))

    y = jax.nn.relu(bn(conv(x, w1), g1, b1))
    z = bn(conv(y, w2), g2, b2)
    return jnp.transpose(jax.nn.relu(z + x), (0, 3, 1, 2))


def init_params(key, num_channels):
    """Deterministic init matching the module's parameter shapes.
    Conv weights kaiming-uniform-ish (no bias); BN gamma=1, beta=0."""
    k1, k2 = jax.random.split(key)
    fan_in = num_channels * 3 * 3
    bound = 1.0 / np.sqrt(fan_in)
    # HWIO: (3, 3, Cin, Cout)  (PyTorch stores (Cout, Cin, 3, 3))
    w1 = jax.random.uniform(k1, (3, 3, num_channels, num_channels),
                            jnp.float32, -bound, bound)
    w2 = jax.random.uniform(k2, (3, 3, num_channels, num_channels),
                            jnp.float32, -bound, bound)
    g1 = jnp.ones((num_channels,), jnp.float32)
    b1 = jnp.zeros((num_channels,), jnp.float32)
    g2 = jnp.ones((num_channels,), jnp.float32)
    b2 = jnp.zeros((num_channels,), jnp.float32)
    return (w1, g1, b1, w2, g2, b2)


if __name__ == "__main__":
    key = jax.random.PRNGKey(0)
    kx, kp = jax.random.split(key)

    # Small shapes consistent with the module; C=8, W=16 makes W*C = 128
    # exactly one lane-width (fully lane-dense stores).
    N, C, H, W = 2, 8, 16, 16
    x = jax.random.normal(kx, (N, C, H, W), jnp.float32)     # NCHW like PyTorch
    params = init_params(kp, C)

    out = jax.block_until_ready(jax.jit(block_forward_nchw)(x, params))
    assert out.shape == (N, C, H, W) and out.dtype == jnp.float32

    ref = jax.block_until_ready(reference_nchw(x, params))
    np.testing.assert_allclose(np.asarray(out), np.asarray(ref),
                               rtol=1e-3, atol=1e-3)
    print("KERNEL_OK")
</pallas_src>

<mosaic_0001>
module attributes {stable_mosaic.version = 11 : i64} {
  func.func @block_kernel(%arg0: memref<32x128xf32, #tpu.memory_space<vmem>>, %arg1: memref<3x128x128xf32, #tpu.memory_space<vmem>>, %arg2: memref<3x128x128xf32, #tpu.memory_space<vmem>>, %arg3: memref<128x128xf32, #tpu.memory_space<vmem>>, %arg4: memref<1x128xf32, #tpu.memory_space<vmem>>, %arg5: memref<1x128xf32, #tpu.memory_space<vmem>>, %arg6: memref<1x128xf32, #tpu.memory_space<vmem>>, %arg7: memref<1x128xf32, #tpu.memory_space<vmem>>, %arg8: memref<32x128xf32, #tpu.memory_space<vmem>>) attributes {dimension_semantics = [], scalar_prefetch = 0 : i64, scratch_operands = 0 : i64, tpu.core_type = #tpu.core_type<tc>} {
    %c0 = arith.constant 0 : index
    %c0_0 = arith.constant 0 : index
    %0 = vector.load %arg0[%c0, %c0_0] : memref<32x128xf32, #tpu.memory_space<vmem>>, vector<32x128xf32>
    %1 = tpu.iota {dimensions = array<i32: 0>} : vector<32x1xi32>
    %c16_i32 = arith.constant 16 : i32
    %c0_i32 = arith.constant 0 : i32
    %2 = arith.cmpi eq, %c16_i32, %c0_i32 : i32
    %c1_i32 = arith.constant 1 : i32
    %3 = arith.select %2, %c1_i32, %c16_i32 : i32
    %4 = vector.broadcast %3 : i32 to vector<32x1xi32>
    %5 = arith.remsi %1, %4 : vector<32x1xi32>
    %c0_i32_1 = arith.constant 0 : i32
    %6 = vector.broadcast %c0_i32_1 : i32 to vector<32x1xi32>
    %7 = arith.cmpi ne, %5, %6 : vector<32x1xi32>
    %c0_i32_2 = arith.constant 0 : i32
    %8 = vector.broadcast %c0_i32_2 : i32 to vector<32x1xi32>
    %9 = arith.cmpi slt, %5, %8 : vector<32x1xi32>
    %c0_i32_3 = arith.constant 0 : i32
    %10 = arith.cmpi slt, %3, %c0_i32_3 : i32
    %11 = vector.broadcast %10 : i1 to vector<32x1xi1>
    %12 = vector.broadcast %11 : vector<32x1xi1> to vector<32x1xi1>
    %13 = arith.xori %9, %12 : vector<32x1xi1>
    %14 = arith.andi %13, %7 : vector<32x1xi1>
    %15 = vector.broadcast %3 : i32 to vector<32x1xi32>
    %16 = arith.addi %5, %15 : vector<32x1xi32>
    %17 = arith.select %14, %16, %5 : vector<32x1xi1>, vector<32x1xi32>
    %cst = arith.constant 0.000000e+00 : f32
    %18 = vector.broadcast %cst : f32 to vector<32x128xf32>
    %c1_i32_4 = arith.constant 1 : i32
    %19 = tpu.dynamic_rotate %0 by %c1_i32_4 dim 0 : vector<32x128xf32>, i32 -> vector<32x128xf32>
    %c-1_i32 = arith.constant -1 : i32
    %20 = vector.broadcast %c-1_i32 : i32 to vector<32x1xi32>
    %21 = arith.addi %17, %20 : vector<32x1xi32>
    %c0_i32_5 = arith.constant 0 : i32
    %22 = vector.broadcast %c0_i32_5 : i32 to vector<32x1xi32>
    %23 = arith.cmpi sge, %21, %22 : vector<32x1xi32>
    %c-1_i32_6 = arith.constant -1 : i32
    %24 = vector.broadcast %c-1_i32_6 : i32 to vector<32x1xi32>
    %25 = arith.addi %17, %24 : vector<32x1xi32>
    %c16_i32_7 = arith.constant 16 : i32
    %26 = vector.broadcast %c16_i32_7 : i32 to vector<32x1xi32>
    %27 = arith.cmpi slt, %25, %26 : vector<32x1xi32>
    %28 = arith.andi %23, %27 : vector<32x1xi1>
    %cst_8 = arith.constant 0.000000e+00 : f32
    %29 = vector.shape_cast %28 : vector<32x1xi1> to vector<32x1xi1>
    %30 = vector.broadcast %29 : vector<32x1xi1> to vector<32x128xi1>
    %31 = vector.broadcast %cst_8 : f32 to vector<32x128xf32>
    %32 = arith.select %30, %19, %31 : vector<32x128xi1>, vector<32x128xf32>
    %c0_9 = arith.constant 0 : index
    %c0_10 = arith.constant 0 : index
    %c0_11 = arith.constant 0 : index
    %33 = vector.load %arg1[%c0_9, %c0_10, %c0_11] : memref<3x128x128xf32, #tpu.memory_space<vmem>>, vector<1x128x128xf32>
    %34 = vector.shape_cast %33 : vector<1x128x128xf32> to vector<128x128xf32>
    %cst_12 = arith.constant dense<0.000000e+00> : vector<32x128xf32>
    %35 = tpu.matmul %32, %34, %cst_12 {dimension_numbers = #tpu.dot_dimension_numbers<[1], [0], [0], [1], [0, 0, 1, 1], [], []>} : vector<32x128xf32>, vector<128x128xf32>, vector<32x128xf32> -> vector<32x128xf32>
    %36 = arith.addf %18, %35 : vector<32x128xf32>
    %c1 = arith.constant 1 : index
    %c0_13 = arith.constant 0 : index
    %c0_14 = arith.constant 0 : index
    %37 = vector.load %arg1[%c1, %c0_13, %c0_14] : memref<3x128x128xf32, #tpu.memory_space<vmem>>, vector<1x128x128xf32>
    %38 = vector.shape_cast %37 : vector<1x128x128xf32> to vector<128x128xf32>
    %cst_15 = arith.constant dense<0.000000e+00> : vector<32x128xf32>
    %39 = tpu.matmul %0, %38, %cst_15 {dimension_numbers = #tpu.dot_dimension_numbers<[1], [0], [0], [1], [0, 0, 1, 1], [], []>} : vector<32x128xf32>, vector<128x128xf32>, vector<32x128xf32> -> vector<32x128xf32>
    %40 = arith.addf %36, %39 : vector<32x128xf32>
    %c31_i32 = arith.constant 31 : i32
    %41 = tpu.dynamic_rotate %0 by %c31_i32 dim 0 : vector<32x128xf32>, i32 -> vector<32x128xf32>
    %c1_i32_16 = arith.constant 1 : i32
    %42 = vector.broadcast %c1_i32_16 : i32 to vector<32x1xi32>
    %43 = arith.addi %17, %42 : vector<32x1xi32>
    %c0_i32_17 = arith.constant 0 : i32
    %44 = vector.broadcast %c0_i32_17 : i32 to vector<32x1xi32>
    %45 = arith.cmpi sge, %43, %44 : vector<32x1xi32>
    %c1_i32_18 = arith.constant 1 : i32
    %46 = vector.broadcast %c1_i32_18 : i32 to vector<32x1xi32>
    %47 = arith.addi %17, %46 : vector<32x1xi32>
    %c16_i32_19 = arith.constant 16 : i32
    %48 = vector.broadcast %c16_i32_19 : i32 to vector<32x1xi32>
    %49 = arith.cmpi slt, %47, %48 : vector<32x1xi32>
    %50 = arith.andi %45, %49 : vector<32x1xi1>
    %cst_20 = arith.constant 0.000000e+00 : f32
    %51 = vector.shape_cast %50 : vector<32x1xi1> to vector<32x1xi1>
    %52 = vector.broadcast %51 : vector<32x1xi1> to vector<32x128xi1>
    %53 = vector.broadcast %cst_20 : f32 to vector<32x128xf32>
    %54 = arith.select %52, %41, %53 : vector<32x128xi1>, vector<32x128xf32>
    %c2 = arith.constant 2 : index
    %c0_21 = arith.constant 0 : index
    %c0_22 = arith.constant 0 : index
    %55 = vector.load %arg1[%c2, %c0_21, %c0_22] : memref<3x128x128xf32, #tpu.memory_space<vmem>>, vector<1x128x128xf32>
    %56 = vector.shape_cast %55 : vector<1x128x128xf32> to vector<128x128xf32>
    %cst_23 = arith.constant dense<0.000000e+00> : vector<32x128xf32>
    %57 = tpu.matmul %54, %56, %cst_23 {dimension_numbers = #tpu.dot_dimension_numbers<[1], [0], [0], [1], [0, 0, 1, 1], [], []>} : vector<32x128xf32>, vector<128x128xf32>, vector<32x128xf32> -> vector<32x128xf32>
    %58 = arith.addf %40, %57 : vector<32x128xf32>
    %cst_24 = arith.constant dense<0.000000e+00> : vector<128xf32>
    %59 = vector.multi_reduction <add>, %58, %cst_24 [0] : vector<32x128xf32> to vector<128xf32>
    %60 = vector.shape_cast %59 : vector<128xf32> to vector<1x128xf32>
    %61 = arith.mulf %58, %58 : vector<32x128xf32>
    %cst_25 = arith.constant dense<0.000000e+00> : vector<128xf32>
    %62 = vector.multi_reduction <add>, %61, %cst_25 [0] : vector<32x128xf32> to vector<128xf32>
    %63 = vector.shape_cast %62 : vector<128xf32> to vector<1x128xf32>
    %c0_26 = arith.constant 0 : index
    %c0_27 = arith.constant 0 : index
    %64 = vector.load %arg3[%c0_26, %c0_27] : memref<128x128xf32, #tpu.memory_space<vmem>>, vector<128x128xf32>
    %cst_28 = arith.constant dense<0.000000e+00> : vector<1x128xf32>
    %65 = tpu.matmul %60, %64, %cst_28 {dimension_numbers = #tpu.dot_dimension_numbers<[1], [0], [0], [1], [0, 0, 1, 1], [], []>} : vector<1x128xf32>, vector<128x128xf32>, vector<1x128xf32> -> vector<1x128xf32>
    %c0_29 = arith.constant 0 : index
    %c0_30 = arith.constant 0 : index
    %66 = vector.load %arg3[%c0_29, %c0_30] : memref<128x128xf32, #tpu.memory_space<vmem>>, vector<128x128xf32>
    %cst_31 = arith.constant dense<0.000000e+00> : vector<1x128xf32>
    %67 = tpu.matmul %63, %66, %cst_31 {dimension_numbers = #tpu.dot_dimension_numbers<[1], [0], [0], [1], [0, 0, 1, 1], [], []>} : vector<1x128xf32>, vector<128x128xf32>, vector<1x128xf32> -> vector<1x128xf32>
    %cst_32 = arith.constant 0.001953125 : f32
    %68 = vector.broadcast %cst_32 : f32 to vector<1x128xf32>
    %69 = arith.mulf %65, %68 : vector<1x128xf32>
    %cst_33 = arith.constant 0.001953125 : f32
    %70 = vector.broadcast %cst_33 : f32 to vector<1x128xf32>
    %71 = arith.mulf %67, %70 : vector<1x128xf32>
    %72 = arith.mulf %69, %69 : vector<1x128xf32>
    %73 = arith.subf %71, %72 : vector<1x128xf32>
    %c0_34 = arith.constant 0 : index
    %c0_35 = arith.constant 0 : index
    %74 = vector.load %arg4[%c0_34, %c0_35] : memref<1x128xf32, #tpu.memory_space<vmem>>, vector<1x128xf32>
    %cst_36 = arith.constant 9.99999974E-6 : f32
    %75 = vector.broadcast %cst_36 : f32 to vector<1x128xf32>
    %76 = arith.addf %73, %75 : vector<1x128xf32>
    %77 = math.rsqrt %76 : vector<1x128xf32>
    %78 = arith.mulf %74, %77 : vector<1x128xf32>
    %c0_37 = arith.constant 0 : index
    %c0_38 = arith.constant 0 : index
    %79 = vector.load %arg5[%c0_37, %c0_38] : memref<1x128xf32, #tpu.memory_space<vmem>>, vector<1x128xf32>
    %80 = arith.mulf %69, %78 : vector<1x128xf32>
    %81 = arith.subf %79, %80 : vector<1x128xf32>
    %82 = vector.broadcast %78 : vector<1x128xf32> to vector<32x128xf32>
    %83 = arith.mulf %58, %82 : vector<32x128xf32>
    %84 = vector.broadcast %81 : vector<1x128xf32> to vector<32x128xf32>
    %85 = arith.addf %83, %84 : vector<32x128xf32>
    %cst_39 = arith.constant 0.000000e+00 : f32
    %86 = vector.broadcast %cst_39 : f32 to vector<32x128xf32>
    %87 = arith.maximumf %85, %86 : vector<32x128xf32>
    %cst_40 = arith.constant 0.000000e+00 : f32
    %88 = vector.broadcast %cst_40 : f32 to vector<32x128xf32>
    %c1_i32_41 = arith.constant 1 : i32
    %89 = tpu.dynamic_rotate %87 by %c1_i32_41 dim 0 : vector<32x128xf32>, i32 -> vector<32x128xf32>
    %c-1_i32_42 = arith.constant -1 : i32
    %90 = vector.broadcast %c-1_i32_42 : i32 to vector<32x1xi32>
    %91 = arith.addi %17, %90 : vector<32x1xi32>
    %c0_i32_43 = arith.constant 0 : i32
    %92 = vector.broadcast %c0_i32_43 : i32 to vector<32x1xi32>
    %93 = arith.cmpi sge, %91, %92 : vector<32x1xi32>
    %c-1_i32_44 = arith.constant -1 : i32
    %94 = vector.broadcast %c-1_i32_44 : i32 to vector<32x1xi32>
    %95 = arith.addi %17, %94 : vector<32x1xi32>
    %c16_i32_45 = arith.constant 16 : i32
    %96 = vector.broadcast %c16_i32_45 : i32 to vector<32x1xi32>
    %97 = arith.cmpi slt, %95, %96 : vector<32x1xi32>
    %98 = arith.andi %93, %97 : vector<32x1xi1>
    %cst_46 = arith.constant 0.000000e+00 : f32
    %99 = vector.shape_cast %98 : vector<32x1xi1> to vector<32x1xi1>
    %100 = vector.broadcast %99 : vector<32x1xi1> to vector<32x128xi1>
    %101 = vector.broadcast %cst_46 : f32 to vector<32x128xf32>
    %102 = arith.select %100, %89, %101 : vector<32x128xi1>, vector<32x128xf32>
    %c0_47 = arith.constant 0 : index
    %c0_48 = arith.constant 0 : index
    %c0_49 = arith.constant 0 : index
    %103 = vector.load %arg2[%c0_47, %c0_48, %c0_49] : memref<3x128x128xf32, #tpu.memory_space<vmem>>, vector<1x128x128xf32>
    %104 = vector.shape_cast %103 : vector<1x128x128xf32> to vector<128x128xf32>
    %cst_50 = arith.constant dense<0.000000e+00> : vector<32x128xf32>
    %105 = tpu.matmul %102, %104, %cst_50 {dimension_numbers = #tpu.dot_dimension_numbers<[1], [0], [0], [1], [0, 0, 1, 1], [], []>} : vector<32x128xf32>, vector<128x128xf32>, vector<32x128xf32> -> vector<32x128xf32>
    %106 = arith.addf %88, %105 : vector<32x128xf32>
    %c1_51 = arith.constant 1 : index
    %c0_52 = arith.constant 0 : index
    %c0_53 = arith.constant 0 : index
    %107 = vector.load %arg2[%c1_51, %c0_52, %c0_53] : memref<3x128x128xf32, #tpu.memory_space<vmem>>, vector<1x128x128xf32>
    %108 = vector.shape_cast %107 : vector<1x128x128xf32> to vector<128x128xf32>
    %cst_54 = arith.constant dense<0.000000e+00> : vector<32x128xf32>
    %109 = tpu.matmul %87, %108, %cst_54 {dimension_numbers = #tpu.dot_dimension_numbers<[1], [0], [0], [1], [0, 0, 1, 1], [], []>} : vector<32x128xf32>, vector<128x128xf32>, vector<32x128xf32> -> vector<32x128xf32>
    %110 = arith.addf %106, %109 : vector<32x128xf32>
    %c31_i32_55 = arith.constant 31 : i32
    %111 = tpu.dynamic_rotate %87 by %c31_i32_55 dim 0 : vector<32x128xf32>, i32 -> vector<32x128xf32>
    %c1_i32_56 = arith.constant 1 : i32
    %112 = vector.broadcast %c1_i32_56 : i32 to vector<32x1xi32>
    %113 = arith.addi %17, %112 : vector<32x1xi32>
    %c0_i32_57 = arith.constant 0 : i32
    %114 = vector.broadcast %c0_i32_57 : i32 to vector<32x1xi32>
    %115 = arith.cmpi sge, %113, %114 : vector<32x1xi32>
    %c1_i32_58 = arith.constant 1 : i32
    %116 = vector.broadcast %c1_i32_58 : i32 to vector<32x1xi32>
    %117 = arith.addi %17, %116 : vector<32x1xi32>
    %c16_i32_59 = arith.constant 16 : i32
    %118 = vector.broadcast %c16_i32_59 : i32 to vector<32x1xi32>
    %119 = arith.cmpi slt, %117, %118 : vector<32x1xi32>
    %120 = arith.andi %115, %119 : vector<32x1xi1>
    %cst_60 = arith.constant 0.000000e+00 : f32
    %121 = vector.shape_cast %120 : vector<32x1xi1> to vector<32x1xi1>
    %122 = vector.broadcast %121 : vector<32x1xi1> to vector<32x128xi1>
    %123 = vector.broadcast %cst_60 : f32 to vector<32x128xf32>
    %124 = arith.select %122, %111, %123 : vector<32x128xi1>, vector<32x128xf32>
    %c2_61 = arith.constant 2 : index
    %c0_62 = arith.constant 0 : index
    %c0_63 = arith.constant 0 : index
    %125 = vector.load %arg2[%c2_61, %c0_62, %c0_63] : memref<3x128x128xf32, #tpu.memory_space<vmem>>, vector<1x128x128xf32>
    %126 = vector.shape_cast %125 : vector<1x128x128xf32> to vector<128x128xf32>
    %cst_64 = arith.constant dense<0.000000e+00> : vector<32x128xf32>
    %127 = tpu.matmul %124, %126, %cst_64 {dimension_numbers = #tpu.dot_dimension_numbers<[1], [0], [0], [1], [0, 0, 1, 1], [], []>} : vector<32x128xf32>, vector<128x128xf32>, vector<32x128xf32> -> vector<32x128xf32>
    %128 = arith.addf %110, %127 : vector<32x128xf32>
    %cst_65 = arith.constant dense<0.000000e+00> : vector<128xf32>
    %129 = vector.multi_reduction <add>, %128, %cst_65 [0] : vector<32x128xf32> to vector<128xf32>
    %130 = vector.shape_cast %129 : vector<128xf32> to vector<1x128xf32>
    %131 = arith.mulf %128, %128 : vector<32x128xf32>
    %cst_66 = arith.constant dense<0.000000e+00> : vector<128xf32>
    %132 = vector.multi_reduction <add>, %131, %cst_66 [0] : vector<32x128xf32> to vector<128xf32>
    %133 = vector.shape_cast %132 : vector<128xf32> to vector<1x128xf32>
    %c0_67 = arith.constant 0 : index
    %c0_68 = arith.constant 0 : index
    %134 = vector.load %arg3[%c0_67, %c0_68] : memref<128x128xf32, #tpu.memory_space<vmem>>, vector<128x128xf32>
    %cst_69 = arith.constant dense<0.000000e+00> : vector<1x128xf32>
    %135 = tpu.matmul %130, %134, %cst_69 {dimension_numbers = #tpu.dot_dimension_numbers<[1], [0], [0], [1], [0, 0, 1, 1], [], []>} : vector<1x128xf32>, vector<128x128xf32>, vector<1x128xf32> -> vector<1x128xf32>
    %c0_70 = arith.constant 0 : index
    %c0_71 = arith.constant 0 : index
    %136 = vector.load %arg3[%c0_70, %c0_71] : memref<128x128xf32, #tpu.memory_space<vmem>>, vector<128x128xf32>
    %cst_72 = arith.constant dense<0.000000e+00> : vector<1x128xf32>
    %137 = tpu.matmul %133, %136, %cst_72 {dimension_numbers = #tpu.dot_dimension_numbers<[1], [0], [0], [1], [0, 0, 1, 1], [], []>} : vector<1x128xf32>, vector<128x128xf32>, vector<1x128xf32> -> vector<1x128xf32>
    %cst_73 = arith.constant 0.001953125 : f32
    %138 = vector.broadcast %cst_73 : f32 to vector<1x128xf32>
    %139 = arith.mulf %135, %138 : vector<1x128xf32>
    %cst_74 = arith.constant 0.001953125 : f32
    %140 = vector.broadcast %cst_74 : f32 to vector<1x128xf32>
    %141 = arith.mulf %137, %140 : vector<1x128xf32>
    %142 = arith.mulf %139, %139 : vector<1x128xf32>
    %143 = arith.subf %141, %142 : vector<1x128xf32>
    %c0_75 = arith.constant 0 : index
    %c0_76 = arith.constant 0 : index
    %144 = vector.load %arg6[%c0_75, %c0_76] : memref<1x128xf32, #tpu.memory_space<vmem>>, vector<1x128xf32>
    %cst_77 = arith.constant 9.99999974E-6 : f32
    %145 = vector.broadcast %cst_77 : f32 to vector<1x128xf32>
    %146 = arith.addf %143, %145 : vector<1x128xf32>
    %147 = math.rsqrt %146 : vector<1x128xf32>
    %148 = arith.mulf %144, %147 : vector<1x128xf32>
    %c0_78 = arith.constant 0 : index
    %c0_79 = arith.constant 0 : index
    %149 = vector.load %arg7[%c0_78, %c0_79] : memref<1x128xf32, #tpu.memory_space<vmem>>, vector<1x128xf32>
    %150 = arith.mulf %139, %148 : vector<1x128xf32>
    %151 = arith.subf %149, %150 : vector<1x128xf32>
    %152 = vector.broadcast %148 : vector<1x128xf32> to vector<32x128xf32>
    %153 = arith.mulf %128, %152 : vector<32x128xf32>
    %154 = vector.broadcast %151 : vector<1x128xf32> to vector<32x128xf32>
    %155 = arith.addf %153, %154 : vector<32x128xf32>
    %156 = arith.addf %155, %0 : vector<32x128xf32>
    %cst_80 = arith.constant 0.000000e+00 : f32
    %157 = vector.broadcast %cst_80 : f32 to vector<32x128xf32>
    %158 = arith.maximumf %156, %157 : vector<32x128xf32>
    %c0_81 = arith.constant 0 : index
    %c0_82 = arith.constant 0 : index
    %159 = vector.load %arg8[%c0_81, %c0_82] : memref<32x128xf32, #tpu.memory_space<vmem>>, vector<32x128xf32>
    tpu.vector_store %arg8[%c0_81, %c0_82], %158 {strides = array<i32>} : memref<32x128xf32, #tpu.memory_space<vmem>>, vector<32x128xf32>,
    return
  }
}

</mosaic_0001>

<bundles_post_ra>
// kernel: block_forward_nchw.1
= control target key start
LH: loop header
LB: loop body
LE: loop exit
PB: predicated region body
PF: predicated region fallthrough
CT: control target
= control target key end

     0   :  { %v2164_v3 = vmov 0.0|0.0   ;;  %v33_v29 = vlaneseq  ;;  %vm2165_vm6 = vmmov 0   ;;  %s2816_s1 = inlined_call_operand.vmem [shape: f32[3,128,128], index: 1, kind: input, shape index: {}]   ;;  %s2817_s0 = inlined_call_operand.vmem [shape: f32[32,128], index: 0, kind: input, shape index: {}]   ;;  %s2818_s3 = inlined_call_operand.vmem [shape: f32[128,128], index: 3, kind: input, shape index: {}]   ;;  %s2819_s2 = inlined_call_operand.vmem [shape: f32[3,128,128], index: 2, kind: input, shape index: {}]   ;;  %s2820_s4 = inlined_call_operand.vmem [shape: f32[1,128], index: 4, kind: input, shape index: {}]   ;;  %s2821_s5 = inlined_call_operand.vmem [shape: f32[1,128], index: 5, kind: input, shape index: {}]   ;;  %s2822_s6 = inlined_call_operand.vmem [shape: f32[1,128], index: 6, kind: input, shape index: {}]   ;;  %s2823_s7 = inlined_call_operand.vmem [shape: f32[1,128], index: 7, kind: input, shape index: {}]   ;;  %s2824_s8 = inlined_call_operand.vmem [shape: f32[32,128], index: 8, kind: output, shape index: {}]  }
   0x1   :  { %v1224_v0 = vld [vmem:[%s2816_s1 + $0x80] sm:$0xff]  ;;  %v1225_v1 = vld [vmem:[%s2816_s1 + $0x88] sm:$0xff]  ;;  %v1226_v2 = vld [vmem:[%s2816_s1 + $0x90] sm:$0xff]  ;;  %1948 = vmatprep.subr.bf16.mxu1 %v2164_v3 }
   0x2   :  { %v1852_v4 = vpack.c.bf16 %v1225_v1, %v1224_v0  ;;  %v1227_v5 = vld [vmem:[%s2816_s1 + $0x98] sm:$0xff]  ;;  %v1228_v7 = vld [vmem:[%s2816_s1 + $0xa0] sm:$0xff]  ;;  %v1229_v8 = vld [vmem:[%s2816_s1 + $0xa8] sm:$0xff]  ;;  %v2294_v36 = vshrl.u32 %v33_v29, 7 }
   0x3   :  { %v1856_v6 = vpack.c.bf16 %v1227_v5, %v1226_v2  ;;  %v1860_v9 = vpack.c.bf16 %v1229_v8, %v1228_v7  ;;  %v2234_v10 = vld [vmem:[%s2817_s0] sm:$0xff]  ;;  %v1230_v11 = vld [vmem:[%s2816_s1 + $0xb0] sm:$0xff]  ;;  %v1231_v12 = vld [vmem:[%s2816_s1 + $0xb8] sm:$0xff] }
   0x4   :  { %1853 = vmatprep.subr.bf16.mxu0 %v1852_v4  ;;  %1516 = vmatprep.mubr.f32.mxu0 %v2234_v10  ;;  %v1864_v13 = vpack.c.bf16 %v1231_v12, %v1230_v11  ;;  %v1232_v14 = vld [vmem:[%s2816_s1 + $0xc0] sm:$0xff]  ;;  %v1233_v15 = vld [vmem:[%s2816_s1 + $0xc8] sm:$0xff]  ;;  %v1234_v17 = vld [vmem:[%s2816_s1 + $0xd0] sm:$0xff]  ;;  %v42_v40 = vand.u32 15, %v2294_v36  ;;  %v86_v45 = vrot.slane %v2234_v10, 7  ;;  %vm90_vm0 = vcmp.lt.s32.totalorder %v2294_v36, 1 }
   0x5   :  { %1855 = vmatpush3.bf16.msra.mxu0 %v1852_v4  ;;  %v1868_v16 = vpack.c.bf16 %v1233_v15, %v1232_v14  ;;  %v1235_v18 = vld [vmem:[%s2816_s1 + $0xd8] sm:$0xff]  ;;  %v1236_v20 = vld [vmem:[%s2816_s1 + $0xe0] sm:$0xff]  ;;  %v492_v22 = vld [vmem:[%s2818_s3 + $0x8] sm:$0xff]  ;;  %v36_v2 = vadd.s32 16, %v2294_v36  ;;  %vm330_vm3 = vcmp.lt.s32.totalorder %v2294_v36, 7 }
   0x6   :  { %1857 = vmatprep.subr.bf16.mxu0 %v1856_v6  ;;  %v1872_v19 = vpack.c.bf16 %v1235_v18, %v1234_v17  ;;  %v491_v21 = vld [vmem:[%s2818_s3] sm:$0xff]  ;;  %v1237_v23 = vld [vmem:[%s2816_s1 + $0xe8] sm:$0xff]  ;;  %v493_v25 = vld [vmem:[%s2818_s3 + $0x10] sm:$0xff]  ;;  %v2329_v49 = vadd.s32 4294967295, %v42_v40  ;;  %v326_v18 = vrot.slane %v2234_v10, 1 }
   0x7   :  { %v2267_v24 = vpack.c.bf16 %v492_v22, %v491_v21  ;;  %v494_v26 = vld [vmem:[%s2818_s3 + $0x18] sm:$0xff]  ;;  %v1876_v28 = vpack.c.bf16 %v1237_v23, %v1236_v20  ;;  %v495_v30 = vld [vmem:[%s2818_s3 + $0x20] sm:$0xff]  ;;  %v496_v31 = vld [vmem:[%s2818_s3 + $0x28] sm:$0xff]  ;;  %v56_v7 = vand.u32 15, %v36_v2 }
   0x8   :  { %v2276_v27 = vpack.c.bf16 %v494_v26, %v493_v25  ;;  %v1238_v32 = vld [vmem:[%s2816_s1 + $0xf0] sm:$0xff]  ;;  %v1239_v33 = vld [vmem:[%s2816_s1 + $0xf8] sm:$0xff]  ;;  %v2292_v34 = vpack.c.bf16 %v496_v31, %v495_v30  ;;  %v123_v37 = vld [vmem:[%s2816_s1] sm:$0xff]  ;;  %vm99_vm1 = vcmp.ge.s32.totalorder %v2329_v49, 0 }
   0x9   :  { %1859 = vmatpush3.bf16.msra.mxu0 %v1856_v6  ;;  %1950 = vmatpush3.bf16.msra.mxu1 %v2267_v24  ;;  %v1880_v35 = vpack.c.bf16 %v1239_v33, %v1238_v32  ;;  %v124_v38 = vld [vmem:[%s2816_s1 + $0x8] sm:$0xff]  ;;  %v125_v41 = vld [vmem:[%s2816_s1 + $0x10] sm:$0xff]  ;;  %v126_v42 = vld [vmem:[%s2816_s1 + $0x18] sm:$0xff]  ;;  %v2387_v14 = vadd.s32 4294967295, %v56_v7 }
   0xa   :  { %1861 = vmatprep.subr.bf16.mxu0 %v1860_v9  ;;  %1951 = vmatprep.subr.bf16.mxu1 %v2164_v3  ;;  %v1884_v39 = vpack.c.bf16 %v124_v38, %v123_v37  ;;  %v2315_v43 = vld [vmem:[%s2817_s0 + $0x18] sm:$0xff]  ;;  %v2320_v44 = vld [vmem:[%s2817_s0 + $0x8] sm:$0xff]  ;;  %v1888_v46 = vpack.c.bf16 %v126_v42, %v125_v41  ;;  %v2326_v47 = vld [vmem:[%s2817_s0 + $0x10] sm:$0xff]  ;;  %v35_v41 = vadd.s32 8, %v2294_v36 }
   0xb   :  { %v89_v48 = vrot.slane %v2315_v43, 7  ;;  %v127_v50 = vld [vmem:[%s2816_s1 + $0x20] sm:$0xff]  ;;  %v128_v51 = vld [vmem:[%s2816_s1 + $0x28] sm:$0xff]  ;;  %v129_v54 = vld [vmem:[%s2816_s1 + $0x30] sm:$0xff]  ;;  %v87_v11 = vrot.slane %v2320_v44, 7  ;;  %v88_v12 = vrot.slane %v2326_v47, 7 }
   0xc   :  { %v1892_v52 = vpack.c.bf16 %v128_v51, %v127_v50  ;;  %v130_v55 = vld [vmem:[%s2816_s1 + $0x38] sm:$0xff]  ;;  %v131_v57 = vld [vmem:[%s2816_s1 + $0x40] sm:$0xff]  ;;  %v132_v58 = vld [vmem:[%s2816_s1 + $0x48] sm:$0xff]  ;;  %vm101_vm2 = vcmp.ge.s32.totalorder %v2387_v14, 0  ;;  %v327_v21 = vrot.slane %v2320_v44, 1  ;;  %v37_v50 = vadd.s32 24, %v2294_v36 }
   0xd   :  { %1863 = vmatpush3.bf16.msra.mxu0 %v1860_v9  ;;  %1953 = vmatpush3.bf16.msra.mxu1 %v2276_v27  ;;  %v94_v53 = vsel %vm90_vm0, %v89_v48, %v86_v45  ;;  %v1896_v56 = vpack.c.bf16 %v130_v55, %v129_v54  ;;  %v1900_v59 = vpack.c.bf16 %v132_v58, %v131_v57  ;;  %v133_v60 = vld [vmem:[%s2816_s1 + $0x50] sm:$0xff]  ;;  %v134_v61 = vld [vmem:[%s2816_s1 + $0x58] sm:$0xff]  ;;  %v135_v63 = vld [vmem:[%s2816_s1 + $0x60] sm:$0xff]  ;;  %v329_v55 = vrot.slane %v2315_v43, 1 }
   0xe   :  { %1865 = vmatprep.subr.bf16.mxu0 %v1864_v13  ;;  %1954 = vmatprep.subr.bf16.mxu1 %v2164_v3  ;;  %v1904_v62 = vpack.c.bf16 %v134_v61, %v133_v60  ;;  %v136_v0 = vld [vmem:[%s2816_s1 + $0x68] sm:$0xff]  ;;  %v137_v4 = vld [vmem:[%s2816_s1 + $0x70] sm:$0xff]  ;;  %v138_v5 = vld [vmem:[%s2816_s1 + $0x78] sm:$0xff]  ;;  %v93_v17 = vsel %vm90_vm0, %v86_v45, %v87_v11  ;;  %v92_v20 = vsel %vm90_vm0, %v87_v11, %v88_v12  ;;  %v63_v54 = vand.u32 15, %v37_v50 }
   0xf   :  { %v1908_v1 = vpack.c.bf16 %v136_v0, %v135_v63  ;;  %v1912_v6 = vpack.c.bf16 %v138_v5, %v137_v4  ;;  %v1242_v8 = vld [vmem:[%s2816_s1 + $0x100] sm:$0xff]  ;;  %v1243_v9 = vld [vmem:[%s2816_s1 + $0x108] sm:$0xff]  ;;  %v1244_v15 = vld [vmem:[%s2816_s1 + $0x110] sm:$0xff]  ;;  %v91_v10 = vsel %vm90_vm0, %v88_v12, %v89_v48  ;;  %v333_v26 = vsel %vm330_vm3, %v326_v18, %v327_v21 }
  0x10   :  { %v1246_v22 = vld [vmem:[%s2816_s1 + $0x120] sm:$0xff]  ;;  %v1247_v23 = vld [vmem:[%s2816_s1 + $0x128] sm:$0xff]  ;;  %v1249_v29 = vld [vmem:[%s2816_s1 + $0x138] sm:$0xff]  ;;  %v49_v48 = vand.u32 15, %v35_v41  ;;  %v2456_v57 = vadd.s32 1, %v63_v54 }
  0x11   :  { %1867 = vmatpush3.bf16.msra.mxu0 %v1864_v13  ;;  %1956 = vmatpush3.bf16.msra.mxu1 %v2292_v34  ;;  %v1916_v13 = vpack.c.bf16 %v1243_v9, %v1242_v8  ;;  %v1924_v25 = vpack.c.bf16 %v1247_v23, %v1246_v22  ;;  %v1250_v31 = vld [vmem:[%s2816_s1 + $0x140] sm:$0xff]  ;;  %v1251_v32 = vld [vmem:[%s2816_s1 + $0x148] sm:$0xff]  ;;  %v1253_v37 = vld [vmem:[%s2816_s1 + $0x158] sm:$0xff] }
  0x12   :  { %1869 = vmatprep.subr.bf16.mxu0 %v1868_v16  ;;  %1957 = vmatprep.subr.bf16.mxu1 %v2164_v3  ;;  %v1932_v33 = vpack.c.bf16 %v1251_v32, %v1250_v31  ;;  %v1255_v40 = vld [vmem:[%s2816_s1 + $0x168] sm:$0xff]  ;;  %v1256_v45 = vld [vmem:[%s2816_s1 + $0x170] sm:$0xff]  ;;  %vm346_vm5 = vcmp.lt.s32.totalorder %v2456_v57, 16  ;;  %v498_v61 = vld [vmem:[%s2818_s3 + $0x38] sm:$0xff] }
  0x13   :  { %v497_v60 = vld [vmem:[%s2818_s3 + $0x30] sm:$0xff]  ;;  %v499_v63 = vld [vmem:[%s2818_s3 + $0x40] sm:$0xff]  ;;  %v500_v0 = vld [vmem:[%s2818_s3 + $0x48] sm:$0xff] }
  0x14   :  { %v501_v2 = vld [vmem:[%s2818_s3 + $0x50] sm:$0xff]  ;;  %v502_v4 = vld [vmem:[%s2818_s3 + $0x58] sm:$0xff]  ;;  %v504_v7 = vld [vmem:[%s2818_s3 + $0x68] sm:$0xff] }
  0x15   :  { %1871 = vmatpush3.bf16.msra.mxu0 %v1868_v16  ;;  %v1245_v16 = vld [vmem:[%s2816_s1 + $0x118] sm:$0xff]  ;;  %v2504_v5 = vpack.c.bf16 %v502_v4, %v501_v2  ;;  %v505_v9 = vld [vmem:[%s2818_s3 + $0x70] sm:$0xff]  ;;  %v1286_v14 = vld [vmem:[%s2819_s2 + $0x140] sm:$0xff] }
  0x16   :  { %1873 = vmatprep.subr.bf16.mxu0 %v1872_v19  ;;  %v506_v11 = vld [vmem:[%s2818_s3 + $0x78] sm:$0xff]  ;;  %v1270_v4 = vld [vmem:[%s2819_s2 + $0xd0] sm:$0xff] }
  0x17   :  { %v2527_v12 = vpack.c.bf16 %v506_v11, %v505_v9  ;;  %v1272_v9 = vld [vmem:[%s2819_s2 + $0xe0] sm:$0xff]  ;;  %v1273_v11 = vld [vmem:[%s2819_s2 + $0xe8] sm:$0xff]  ;;  %v705_v49 = vld [vmem:[%s2819_s2 + $0x58] sm:$0xff] }
  0x19   :  { %1875 = vmatpush3.bf16.msra.mxu0 %v1872_v19  ;;  %v1920_v19 = vpack.c.bf16 %v1245_v16, %v1244_v15 }
  0x1a   :  { %1877 = vmatprep.subr.bf16.mxu0 %v1876_v28 }
  0x1d   :  { %1879 = vmatpush3.bf16.msra.mxu0 %v1876_v28  ;;  %v1248_v28 = vld [vmem:[%s2816_s1 + $0x130] sm:$0xff] }
  0x1e   :  { %1881 = vmatprep.subr.bf16.mxu0 %v1880_v35  ;;  %v1928_v30 = vpack.c.bf16 %v1249_v29, %v1248_v28 }
  0x21   :  { %1883 = vmatpush3.bf16.msra.mxu0 %v1880_v35  ;;  %v1252_v35 = vld [vmem:[%s2816_s1 + $0x150] sm:$0xff] }
  0x22   :  { %1885 = vmatprep.subr.bf16.mxu0 %v1884_v39  ;;  %v1936_v38 = vpack.c.bf16 %v1253_v37, %v1252_v35 }
  0x24   :  { %1517 = vmatmul.mubr.f32.vlgmr.msra.gmra.mrb[0].mxu0 %v2320_v44 }
  0x25   :  { %1887 = vmatpush3.bf16.msra.mxu0 %v1884_v39  ;;  %1519 = vmatprep.mubr.f32.mxu0 %v2326_v47  ;;  %v1254_v39 = vld [vmem:[%s2816_s1 + $0x160] sm:$0xff] }
  0x26   :  { %1889 = vmatprep.subr.bf16.mxu0 %v1888_v46  ;;  %v1940_v42 = vpack.c.bf16 %v1255_v40, %v1254_v39 }
  0x28   :  { %1520 = vmatmul.mubr.f32.gmra.mrb[2].mxu0 %v2315_v43 }
  0x29   :  { %1891 = vmatpush3.bf16.msra.mxu0 %v1888_v46  ;;  %1554 = vmatprep.mubr.msk.f32.mxu0 %vm99_vm1, %v94_v53  ;;  %v1257_v46 = vld [vmem:[%s2816_s1 + $0x178] sm:$0xff]  ;;  %v2450_v53 = vadd.s32 1, %v49_v48  ;;  %v1261_v48 = vld [vmem:[%s2819_s2 + $0x88] sm:$0xff] }
  0x2a   :  { %1893 = vmatprep.subr.bf16.mxu0 %v1892_v52  ;;  %v1944_v51 = vpack.c.bf16 %v1257_v46, %v1256_v45  ;;  %v1260_v46 = vld [vmem:[%s2819_s2 + $0x80] sm:$0xff] }
  0x2b   :  { %vm344_vm4 = vcmp.lt.s32.totalorder %v2450_v53, 16  ;;  %v1996_v50 = vpack.c.bf16 %v1261_v48, %v1260_v46 }
  0x2d   :  { %1895 = vmatpush3.bf16.msra.mxu0 %v1892_v52  ;;  %v328_v52 = vrot.slane %v2326_v47, 1 }
  0x2e   :  { %1897 = vmatprep.subr.bf16.mxu0 %v1896_v56 }
  0x2f   :  { %v331_v58 = vsel %vm330_vm3, %v328_v52, %v329_v55 }
  0x31   :  { %1899 = vmatpush3.bf16.msra.mxu0 %v1896_v56  ;;  %v332_v56 = vsel %vm330_vm3, %v327_v21, %v328_v52  ;;  %v1263_v52 = vld [vmem:[%s2819_s2 + $0x98] sm:$0xff] }
  0x32   :  { %1901 = vmatprep.subr.bf16.mxu0 %v1900_v59 }
  0x35   :  { %1903 = vmatpush3.bf16.msra.mxu0 %v1900_v59  ;;  %v334_v59 = vsel %vm330_vm3, %v329_v55, %v326_v18  ;;  %v1264_v55 = vld [vmem:[%s2819_s2 + $0xa0] sm:$0xff] }
  0x36   :  { %1905 = vmatprep.subr.bf16.mxu0 %v1904_v62 }
  0x39   :  { %1907 = vmatpush3.bf16.msra.mxu0 %v1904_v62  ;;  %v2480_v62 = vpack.c.bf16 %v498_v61, %v497_v60  ;;  %v1267_v60 = vld [vmem:[%s2819_s2 + $0xb8] sm:$0xff] }
  0x3a   :  { %1909 = vmatprep.subr.bf16.mxu0 %v1908_v1 }
  0x3b   :  { %1959 = vmatpush3.bf16.msra.mxu1 %v2480_v62 }
  0x3c   :  { %1960 = vmatprep.subr.bf16.mxu1 %v2164_v3 }
  0x3d   :  { %1911 = vmatpush3.bf16.msra.mxu0 %v1908_v1  ;;  %v2492_v1 = vpack.c.bf16 %v500_v0, %v499_v63  ;;  %v1268_v63 = vld [vmem:[%s2819_s2 + $0xc0] sm:$0xff]  ;;  %v1269_v0 = vld [vmem:[%s2819_s2 + $0xc8] sm:$0xff] }
  0x3e   :  { %1913 = vmatprep.subr.bf16.mxu0 %v1912_v6  ;;  %v2012_v2 = vpack.c.bf16 %v1269_v0, %v1268_v63 }
  0x3f   :  { %1962 = vmatpush3.bf16.msra.mxu1 %v2492_v1 }
  0x40   :  { %1963 = vmatprep.subr.bf16.mxu1 %v2164_v3 }
  0x41   :  { %1915 = vmatpush3.bf16.msra.mxu0 %v1912_v6  ;;  %v503_v6 = vld [vmem:[%s2818_s3 + $0x60] sm:$0xff] }
  0x42   :  { %1917 = vmatprep.subr.bf16.mxu0 %v1916_v13  ;;  %v2516_v8 = vpack.c.bf16 %v504_v7, %v503_v6  ;;  %v1271_v6 = vld [vmem:[%s2819_s2 + $0xd8] sm:$0xff] }
  0x43   :  { %1965 = vmatpush3.bf16.msra.mxu1 %v2504_v5  ;;  %v2016_v7 = vpack.c.bf16 %v1271_v6, %v1270_v4  ;;  %v699_v4 = vld [vmem:[%s2819_s2 + $0x28] sm:$0xff] }
  0x44   :  { %1555 = vmatmul.mubr.f32.vlgmr.msra.gmra.mrb[0].mxu0 %v93_v17  ;;  %1966 = vmatprep.subr.bf16.mxu1 %v2164_v3 }
  0x45   :  { %1919 = vmatpush3.bf16.msra.mxu0 %v1916_v13  ;;  %1557 = vmatprep.mubr.msk.f32.mxu0 %vm101_vm2, %v92_v20  ;;  %v2166_v13 = vmov 0.0  }
  0x46   :  { %1921 = vmatprep.subr.bf16.mxu0 %v1920_v19  ;;  %1630 = vmatprep.mubr.msk.f32.mxu1 %vm2165_vm6, %v2166_v13 }
  0x47   :  { %1968 = vmatpush3.bf16.msra.mxu1 %v2516_v8 }
  0x48   :  { %1558 = vmatmul.mubr.f32.gmra.mrb[2].mxu0 %v91_v10  ;;  %1969 = vmatprep.subr.bf16.mxu1 %v2164_v3 }
  0x49   :  { %1923 = vmatpush3.bf16.msra.mxu0 %v1920_v19  ;;  %1592 = vmatprep.mubr.f32.mxu0 %v333_v26 }
  0x4a   :  { %1925 = vmatprep.subr.bf16.mxu0 %v1924_v25 }
  0x4b   :  { %1971 = vmatpush3.bf16.msra.mxu1 %v2527_v12 }
  0x4c   :  { %1972 = vmatprep.subr.bf16.mxu1 %v2164_v3 }
  0x4d   :  { %1927 = vmatpush3.bf16.msra.mxu0 %v1924_v25 }
  0x4e   :  { %1929 = vmatprep.subr.bf16.mxu0 %v1928_v30 }
  0x51   :  { %1931 = vmatpush3.bf16.msra.mxu0 %v1928_v30 }
  0x52   :  { %1933 = vmatprep.subr.bf16.mxu0 %v1932_v33 }
  0x55   :  { %1935 = vmatpush3.bf16.msra.mxu0 %v1932_v33 }
  0x56   :  { %1937 = vmatprep.subr.bf16.mxu0 %v1936_v38 }
  0x59   :  { %1939 = vmatpush3.bf16.msra.mxu0 %v1936_v38 }
  0x5a   :  { %1941 = vmatprep.subr.bf16.mxu0 %v1940_v42 }
  0x5d   :  { %1943 = vmatpush3.bf16.msra.mxu0 %v1940_v42 }
  0x5e   :  { %1945 = vmatprep.subr.bf16.mxu0 %v1944_v51 }
  0x61   :  { %1947 = vmatpush3.bf16.msra.mxu0 %v1944_v51  ;;  %v1262_v51 = vld [vmem:[%s2819_s2 + $0x90] sm:$0xff] }
  0x62   :  { %2092 = vmatprep.subr.bf16.mxu0 %v2164_v3  ;;  %v2000_v54 = vpack.c.bf16 %v1263_v52, %v1262_v51 }
  0x64   :  { %1593 = vmatmul.mubr.msk.f32.vlgmr.msra.gmra.mrb[0].mxu0 %vm344_vm4, %v332_v56  ;;  %v1265_v56 = vld [vmem:[%s2819_s2 + $0xa8] sm:$0xff] }
  0x65   :  { %1595 = vmatprep.mubr.f32.mxu0 %v331_v58  ;;  %2094 = vmatpush3.bf16.msra.mxu0 %v2267_v24  ;;  %v2004_v58 = vpack.c.bf16 %v1265_v56, %v1264_v55 }
  0x66   :  { %2095 = vmatprep.subr.bf16.mxu0 %v2164_v3 }
  0x68   :  { %1596 = vmatmul.mubr.msk.f32.gmra.mrb[2].mxu0 %vm346_vm5, %v334_v59  ;;  %v1266_v59 = vld [vmem:[%s2819_s2 + $0xb0] sm:$0xff] }
  0x69   :  { %2097 = vmatpush3.bf16.msra.mxu0 %v2276_v27  ;;  %1814 = vmatprep.mubr.msk.f32.mxu0 %vm2165_vm6, %v2166_v13  ;;  %v2008_v61 = vpack.c.bf16 %v1267_v60, %v1266_v59  ;;  %v696_v60 = vld [vmem:[%s2819_s2 + $0x10] sm:$0xff] }
  0x6a   :  { %2098 = vmatprep.subr.bf16.mxu0 %v2164_v3 }
  0x6d   :  { %2100 = vmatpush3.bf16.msra.mxu0 %v2292_v34 }
  0x6e   :  { %2101 = vmatprep.subr.bf16.mxu0 %v2164_v3 }
  0x71   :  { %2103 = vmatpush3.bf16.msra.mxu0 %v2480_v62 }
  0x72   :  { %2104 = vmatprep.subr.bf16.mxu0 %v2164_v3 }
  0x75   :  { %2106 = vmatpush3.bf16.msra.mxu0 %v2492_v1 }
  0x76   :  { %2107 = vmatprep.subr.bf16.mxu0 %v2164_v3 }
  0x79   :  { %2109 = vmatpush3.bf16.msra.mxu0 %v2504_v5 }
  0x7a   :  { %2110 = vmatprep.subr.bf16.mxu0 %v2164_v3 }
  0x7d   :  { %2112 = vmatpush3.bf16.msra.mxu0 %v2516_v8 }
  0x7e   :  { %2113 = vmatprep.subr.bf16.mxu0 %v2164_v3 }
  0x81   :  { %2115 = vmatpush3.bf16.msra.mxu0 %v2527_v12 }
  0x82   :  { %2116 = vmatprep.subr.bf16.mxu0 %v2164_v3 }
 0x137   :  { %v2538_v15 = vpop.f32.mrb[0].mxu0 }
 0x138   :  { %v479_v16 = vmul.f32 %v2538_v15, %v2538_v15  ;;  %v2542_v17 = vpop.f32.mrb[1].mxu0 }
 0x139   :  { %v469_v18 = vadd.f32 %v2538_v15, %v2542_v17  ;;  %v478_v19 = vmul.f32 %v2542_v17, %v2542_v17 }
 0x13b   :  { %v482_v20 = vadd.f32 %v479_v16, %v478_v19  ;;  %v2548_v21 = vpop.f32.mrb[2].mxu0  ;;  %v1274_v16 = vld [vmem:[%s2819_s2 + $0xf0] sm:$0xff]  ;;  %v1275_v19 = vld [vmem:[%s2819_s2 + $0xf8] sm:$0xff] }
 0x13c   :  { %v2550_v22 = vpop.f32.mrb[3].mxu0  ;;  %v481_v25 = vmul.f32 %v2548_v21, %v2548_v21 }
 0x13d   :  { %v470_v23 = vadd.f32 %v469_v18, %v2550_v22  ;;  %v480_v10 = vmul.f32 %v2550_v22, %v2550_v22  ;;  %v2020_v18 = vpack.c.bf16 %v1273_v11, %v1272_v9 }
 0x13f   :  { %v471_v26 = vadd.f32 %v2548_v21, %v470_v23  ;;  %v483_v28 = vadd.f32 %v482_v20, %v480_v10  ;;  %v2024_v20 = vpack.c.bf16 %v1275_v19, %v1274_v16  ;;  %v694_v23 = vld [vmem:[%s2819_s2] sm:$0xff]  ;;  %v695_v10 = vld [vmem:[%s2819_s2 + $0x8] sm:$0xff] }
 0x141   :  { %v472_v29 = vrot.slane %v471_v26, 4  ;;  %v484_v30 = vadd.f32 %v483_v28, %v481_v25  ;;  %v2028_v25 = vpack.c.bf16 %v695_v10, %v694_v23 }
 0x143   :  { %v473_v31 = vadd.f32 %v472_v29, %v471_v26  ;;  %v485_v38 = vrot.slane %v484_v30, 4 }
 0x145   :  { %v474_v32 = vrot.slane %v473_v31, 2  ;;  %v486_v39 = vadd.f32 %v485_v38, %v484_v30  ;;  %v651_v38 = vld [vmem:[%s2820_s4] sm:$0x1] }
 0x147   :  { %v475_v33 = vadd.f32 %v474_v32, %v473_v31  ;;  %v487_v40 = vrot.slane %v486_v39, 2 }
 0x149   :  { %v476_v35 = vrot.slane %v475_v33, 1  ;;  %v488_v41 = vadd.f32 %v487_v40, %v486_v39  ;;  %v2633_v39 = vsub.s32 0, %v2294_v36 }
 0x14b   :  { %v477_v37 = vadd.f32 %v476_v35, %v475_v33  ;;  %v489_v42 = vrot.slane %v488_v41, 1 }
 0x14d   :  { %1631 = vmatmul.mubr.f32.vlgmr.msra.gmra.mrb[0].mxu1 %v477_v37  ;;  %v490_v45 = vadd.f32 %v489_v42, %v488_v41  ;;  %v655_v42 = vld [vmem:[%s2821_s5] sm:$0x1] }
 0x14e   :  { %1974 = vmatpush3.bf16.msra.mxu1 %v2267_v24  ;;  %1665 = vmatprep.mubr.msk.f32.mxu1 %vm2165_vm6, %v2166_v13 }
 0x14f   :  { %1975 = vmatprep.subr.bf16.mxu1 %v2164_v3 }
 0x152   :  { %1977 = vmatpush3.bf16.msra.mxu1 %v2276_v27 }
 0x153   :  { %1978 = vmatprep.subr.bf16.mxu1 %v2164_v3 }
 0x156   :  { %1980 = vmatpush3.bf16.msra.mxu1 %v2292_v34 }
 0x157   :  { %1981 = vmatprep.subr.bf16.mxu1 %v2164_v3 }
 0x15a   :  { %1983 = vmatpush3.bf16.msra.mxu1 %v2480_v62 }
 0x15b   :  { %1984 = vmatprep.subr.bf16.mxu1 %v2164_v3 }
 0x15e   :  { %1986 = vmatpush3.bf16.msra.mxu1 %v2492_v1 }
 0x15f   :  { %1987 = vmatprep.subr.bf16.mxu1 %v2164_v3 }
 0x162   :  { %1989 = vmatpush3.bf16.msra.mxu1 %v2504_v5 }
 0x163   :  { %1990 = vmatprep.subr.bf16.mxu1 %v2164_v3 }
 0x166   :  { %1992 = vmatpush3.bf16.msra.mxu1 %v2516_v8 }
 0x167   :  { %1993 = vmatprep.subr.bf16.mxu1 %v2164_v3 }
 0x16a   :  { %1995 = vmatpush3.bf16.msra.mxu1 %v2527_v12 }
 0x16b   :  { %1997 = vmatprep.subr.bf16.mxu1 %v1996_v50 }
 0x16d   :  { %1666 = vmatmul.mubr.f32.vlgmr.msra.gmra.mrb[2].mxu1 %v490_v45 }
 0x16e   :  { %1999 = vmatpush3.bf16.msra.mxu1 %v1996_v50 }
 0x16f   :  { %2001 = vmatprep.subr.bf16.mxu1 %v2000_v54 }
 0x172   :  { %2003 = vmatpush3.bf16.msra.mxu1 %v2000_v54 }
 0x173   :  { %2005 = vmatprep.subr.bf16.mxu1 %v2004_v58 }
 0x176   :  { %2007 = vmatpush3.bf16.msra.mxu1 %v2004_v58 }
 0x177   :  { %2009 = vmatprep.subr.bf16.mxu1 %v2008_v61 }
 0x17a   :  { %2011 = vmatpush3.bf16.msra.mxu1 %v2008_v61  ;;  %v697_v61 = vld [vmem:[%s2819_s2 + $0x18] sm:$0xff] }
 0x17b   :  { %2013 = vmatprep.subr.bf16.mxu1 %v2012_v2 }
 0x17e   :  { %2015 = vmatpush3.bf16.msra.mxu1 %v2012_v2  ;;  %v2032_v2 = vpack.c.bf16 %v697_v61, %v696_v60  ;;  %v1282_v61 = vld [vmem:[%s2819_s2 + $0x120] sm:$0xff] }
 0x17f   :  { %2017 = vmatprep.subr.bf16.mxu1 %v2016_v7 }
 0x182   :  { %2019 = vmatpush3.bf16.msra.mxu1 %v2016_v7 }
 0x183   :  { %2021 = vmatprep.subr.bf16.mxu1 %v2020_v18 }
 0x186   :  { %2023 = vmatpush3.bf16.msra.mxu1 %v2020_v18 }
 0x187   :  { %2025 = vmatprep.subr.bf16.mxu1 %v2024_v20 }
 0x18a   :  { %2027 = vmatpush3.bf16.msra.mxu1 %v2024_v20 }
 0x18b   :  { %2029 = vmatprep.subr.bf16.mxu1 %v2028_v25 }
 0x220   :  { %v573_v26 = vpop.f32.mrb[0].mxu1 }
 0x221   :  { %v1632_v28 = vpop.f32.mrb[1].mxu1  ;;  %v647_v29 = vmul.f32 0.001953125, %v573_v26 }
 0x223   :  { %v649_v31 = vmul.f32 %v647_v29, %v647_v29 }
 0x240   :  { %v643_v30 = vpop.f32.mrb[2].mxu1 }
 0x241   :  { %v648_v32 = vmul.f32 0.001953125, %v643_v30  ;;  %v1667_v33 = vpop.f32.mrb[3].mxu1 }
 0x243   :  { %v650_v35 = vsub.f32 %v648_v32, %v649_v31  ;;  %v700_v31 = vld [vmem:[%s2819_s2 + $0x30] sm:$0xff]  ;;  %v701_v32 = vld [vmem:[%s2819_s2 + $0x38] sm:$0xff] }
 0x245   :  { %v652_v37 = vadd.f32 1e-05, %v650_v35 }
 0x247   :  { %2159 = vrsqrt.f32 %v652_v37  ;;  %v2040_v37 = vpack.c.bf16 %v701_v32, %v700_v31 }
 0x251   :  { %v2160_v40 = vpop.eup %2159 }
 0x252   :  { %v654_v41 = vmul.f32 %v2160_v40, %v651_v38  ;;  %v702_v38 = vld [vmem:[%s2819_s2 + $0x40] sm:$0xff]  ;;  %v703_v40 = vld [vmem:[%s2819_s2 + $0x48] sm:$0xff] }
 0x253   :  { %v2044_v36 = vpack.c.bf16 %v703_v40, %v702_v38 }
 0x254   :  { %v656_v45 = vmul.f32 %v654_v41, %v647_v29  ;;  %v662_v46 = vrot.slane %v654_v41, %v2633_v39  ;;  %v704_v41 = vld [vmem:[%s2819_s2 + $0x50] sm:$0xff] }
 0x256   :  { %v657_v48 = vsub.f32 %v655_v42, %v656_v45  ;;  %v664_v50 = vmul.f32 %v662_v46, %v2542_v17  ;;  %v665_v51 = vmul.f32 %v2538_v15, %v662_v46  ;;  %v666_v52 = vmul.f32 %v662_v46, %v2550_v22  ;;  %v706_v45 = vld [vmem:[%s2819_s2 + $0x60] sm:$0xff] }
 0x257   :  { %v667_v54 = vmul.f32 %v2548_v21, %v662_v46  ;;  %v698_v21 = vld [vmem:[%s2819_s2 + $0x20] sm:$0xff]  ;;  %v2048_v42 = vpack.c.bf16 %v705_v49, %v704_v41  ;;  %v707_v46 = vld [vmem:[%s2819_s2 + $0x68] sm:$0xff] }
 0x258   :  { %v672_v55 = vrot.slane %v657_v48, %v2633_v39  ;;  %v2036_v10 = vpack.c.bf16 %v699_v4, %v698_v21  ;;  %v2052_v48 = vpack.c.bf16 %v707_v46, %v706_v45  ;;  %v1288_v4 = vld [vmem:[%s2819_s2 + $0x150] sm:$0xff] }
 0x25a   :  { %v674_v56 = vadd.f32 %v672_v55, %v664_v50  ;;  %v675_v58 = vadd.f32 %v672_v55, %v665_v51  ;;  %v676_v59 = vadd.f32 %v672_v55, %v666_v52  ;;  %v677_v17 = vadd.f32 %v672_v55, %v667_v54  ;;  %v708_v50 = vld [vmem:[%s2819_s2 + $0x70] sm:$0xff]  ;;  %v709_v51 = vld [vmem:[%s2819_s2 + $0x78] sm:$0xff]  ;;  %v1278_v54 = vld [vmem:[%s2819_s2 + $0x100] sm:$0xff] }
 0x25b   :  { %v2056_v52 = vpack.c.bf16 %v709_v51, %v708_v50  ;;  %v1279_v55 = vld [vmem:[%s2819_s2 + $0x108] sm:$0xff] }
 0x25c   :  { %v678_v63 = vmax.f32 %v674_v56, 0.0  ;;  %v679_v15 = vmax.f32 %v675_v58, 0.0  ;;  %v680_v0 = vmax.f32 %v676_v59, 0.0  ;;  %v681_v22 = vmax.f32 %v677_v17, 0.0  ;;  %v1280_v58 = vld [vmem:[%s2819_s2 + $0x110] sm:$0xff]  ;;  %v1281_v59 = vld [vmem:[%s2819_s2 + $0x118] sm:$0xff] }
 0x25d   :  { %v2060_v56 = vpack.c.bf16 %v1279_v55, %v1278_v54  ;;  %v2064_v60 = vpack.c.bf16 %v1281_v59, %v1280_v58  ;;  %v1283_v17 = vld [vmem:[%s2819_s2 + $0x128] sm:$0xff] }
 0x25e   :  { %1700 = vmatprep.mubr.f32.mxu1 %v678_v63  ;;  %v899_v6 = vrot.slane %v680_v0, 1  ;;  %v682_v7 = vrot.slane %v678_v63, 7  ;;  %v685_v9 = vrot.slane %v681_v22, 7  ;;  %v683_v11 = vrot.slane %v679_v15, 7 }
 0x25f   :  { %1701 = vmatmul.mubr.f32.vlgmr.msra.gmra.mrb[4].mxu1 %v679_v15  ;;  %v684_v16 = vrot.slane %v680_v0, 7  ;;  %v897_v18 = vrot.slane %v678_v63, 1  ;;  %v898_v19 = vrot.slane %v679_v15, 1  ;;  %v900_v20 = vrot.slane %v681_v22, 1  ;;  %v1284_v15 = vld [vmem:[%s2819_s2 + $0x130] sm:$0xff] }
 0x260   :  { %2031 = vmatpush3.bf16.msra.mxu1 %v2028_v25  ;;  %1703 = vmatprep.mubr.f32.mxu1 %v680_v0  ;;  %v689_v23 = vsel %vm90_vm0, %v685_v9, %v682_v7  ;;  %v688_v26 = vsel %vm90_vm0, %v682_v7, %v683_v11  ;;  %v2068_v63 = vpack.c.bf16 %v1283_v17, %v1282_v61  ;;  %v1285_v0 = vld [vmem:[%s2819_s2 + $0x138] sm:$0xff] }
 0x261   :  { %2033 = vmatprep.subr.bf16.mxu1 %v2032_v2  ;;  %v687_v28 = vsel %vm90_vm0, %v683_v11, %v684_v16  ;;  %v686_v29 = vsel %vm90_vm0, %v684_v16, %v685_v9  ;;  %v903_v30 = vsel %vm330_vm3, %v897_v18, %v898_v19  ;;  %v2668_v25 = vsel %vm330_vm3, %v898_v19, %v899_v6  ;;  %v1290_v9 = vld [vmem:[%s2819_s2 + $0x160] sm:$0xff]  ;;  %v1291_v11 = vld [vmem:[%s2819_s2 + $0x168] sm:$0xff]  ;;  %v1293_v19 = vld [vmem:[%s2819_s2 + $0x178] sm:$0xff] }
 0x262   :  { %v2678_v33 = vsel %vm330_vm3, %v899_v6, %v900_v20  ;;  %v2682_v35 = vsel %vm330_vm3, %v900_v20, %v897_v18  ;;  %v1289_v6 = vld [vmem:[%s2819_s2 + $0x158] sm:$0xff]  ;;  %v2084_v16 = vpack.c.bf16 %v1291_v11, %v1290_v9  ;;  %v1292_v18 = vld [vmem:[%s2819_s2 + $0x170] sm:$0xff] }
 0x263   :  { %1704 = vmatmul.mubr.f32.gmra.mrb[6].mxu1 %v681_v22  ;;  %v2072_v22 = vpack.c.bf16 %v1285_v0, %v1284_v15  ;;  %v2080_v7 = vpack.c.bf16 %v1289_v6, %v1288_v4  ;;  %v2088_v20 = vpack.c.bf16 %v1293_v19, %v1292_v18  ;;  %v2163_v4 = vld [vmem:[%s2817_s0] sm:$0xff] }
 0x264   :  { %2035 = vmatpush3.bf16.msra.mxu1 %v2032_v2  ;;  %1738 = vmatprep.mubr.msk.f32.mxu1 %vm99_vm1, %v689_v23  ;;  %v1287_v2 = vld [vmem:[%s2819_s2 + $0x148] sm:$0xff] }
 0x265   :  { %2037 = vmatprep.subr.bf16.mxu1 %v2036_v10  ;;  %v2076_v21 = vpack.c.bf16 %v1287_v2, %v1286_v14 }
 0x268   :  { %2039 = vmatpush3.bf16.msra.mxu1 %v2036_v10 }
 0x269   :  { %2041 = vmatprep.subr.bf16.mxu1 %v2040_v37 }
 0x26c   :  { %2043 = vmatpush3.bf16.msra.mxu1 %v2040_v37 }
 0x26d   :  { %2045 = vmatprep.subr.bf16.mxu1 %v2044_v36 }
 0x270   :  { %2047 = vmatpush3.bf16.msra.mxu1 %v2044_v36 }
 0x271   :  { %2049 = vmatprep.subr.bf16.mxu1 %v2048_v42 }
 0x274   :  { %2051 = vmatpush3.bf16.msra.mxu1 %v2048_v42 }
 0x275   :  { %2053 = vmatprep.subr.bf16.mxu1 %v2052_v48 }
 0x278   :  { %2055 = vmatpush3.bf16.msra.mxu1 %v2052_v48 }
 0x279   :  { %2057 = vmatprep.subr.bf16.mxu1 %v2056_v52 }
 0x27c   :  { %2059 = vmatpush3.bf16.msra.mxu1 %v2056_v52 }
 0x27d   :  { %2061 = vmatprep.subr.bf16.mxu1 %v2060_v56 }
 0x27f   :  { %1739 = vmatmul.mubr.f32.vlgmr.msra.gmra.mrb[4].mxu1 %v688_v26 }
 0x280   :  { %1741 = vmatprep.mubr.msk.f32.mxu1 %vm101_vm2, %v687_v28  ;;  %2063 = vmatpush3.bf16.msra.mxu1 %v2060_v56 }
 0x281   :  { %2065 = vmatprep.subr.bf16.mxu1 %v2064_v60 }
 0x283   :  { %1742 = vmatmul.mubr.f32.gmra.mrb[6].mxu1 %v686_v29 }
 0x284   :  { %2067 = vmatpush3.bf16.msra.mxu1 %v2064_v60  ;;  %1776 = vmatprep.mubr.f32.mxu1 %v903_v30 }
 0x285   :  { %2069 = vmatprep.subr.bf16.mxu1 %v2068_v63 }
 0x288   :  { %2071 = vmatpush3.bf16.msra.mxu1 %v2068_v63 }
 0x289   :  { %2073 = vmatprep.subr.bf16.mxu1 %v2072_v22 }
 0x28c   :  { %2075 = vmatpush3.bf16.msra.mxu1 %v2072_v22 }
 0x28d   :  { %2077 = vmatprep.subr.bf16.mxu1 %v2076_v21 }
 0x290   :  { %2079 = vmatpush3.bf16.msra.mxu1 %v2076_v21 }
 0x291   :  { %2081 = vmatprep.subr.bf16.mxu1 %v2080_v7 }
 0x294   :  { %2083 = vmatpush3.bf16.msra.mxu1 %v2080_v7 }
 0x295   :  { %2085 = vmatprep.subr.bf16.mxu1 %v2084_v16 }
 0x298   :  { %2087 = vmatpush3.bf16.msra.mxu1 %v2084_v16 }
 0x299   :  { %2089 = vmatprep.subr.bf16.mxu1 %v2088_v20 }
 0x29c   :  { %2091 = vmatpush3.bf16.msra.mxu1 %v2088_v20 }
 0x29f   :  { %1777 = vmatmul.mubr.msk.f32.vlgmr.msra.gmra.mrb[4].mxu1 %vm344_vm4, %v2668_v25 }
 0x2a0   :  { %1779 = vmatprep.mubr.f32.mxu1 %v2678_v33 }
 0x2a3   :  { %1780 = vmatmul.mubr.msk.f32.gmra.mrb[6].mxu1 %vm346_vm5, %v2682_v35 }
 0x372   :  { %v2767_v23 = vpop.f32.mrb[4].mxu1 }
 0x373   :  { %v1025_v10 = vmul.f32 %v2767_v23, %v2767_v23  ;;  %v992_v26 = vpop.f32.mrb[5].mxu1 }
 0x374   :  { %v1015_v28 = vadd.f32 %v2767_v23, %v992_v26  ;;  %v1024_v29 = vmul.f32 %v992_v26, %v992_v26 }
 0x376   :  { %v1028_v30 = vadd.f32 %v1025_v10, %v1024_v29  ;;  %v1781_v31 = vpop.f32.mrb[6].mxu1 }
 0x377   :  { %v1002_v32 = vpop.f32.mrb[7].mxu1  ;;  %v1027_v37 = vmul.f32 %v1781_v31, %v1781_v31 }
 0x378   :  { %v1016_v53 = vadd.f32 %v1015_v28, %v1002_v32  ;;  %v1026_v25 = vmul.f32 %v1002_v32, %v1002_v32 }
 0x37a   :  { %v1017_v33 = vadd.f32 %v1781_v31, %v1016_v53  ;;  %v1029_v38 = vadd.f32 %v1028_v30, %v1026_v25 }
 0x37c   :  { %v1018_v40 = vrot.slane %v1017_v33, 4  ;;  %v1030_v57 = vadd.f32 %v1029_v38, %v1027_v37 }
 0x37e   :  { %v1019_v35 = vadd.f32 %v1018_v40, %v1017_v33  ;;  %v1031_v45 = vrot.slane %v1030_v57, 4 }
 0x380   :  { %v1020_v36 = vrot.slane %v1019_v35, 2  ;;  %v1032_v46 = vadd.f32 %v1031_v45, %v1030_v57 }
 0x382   :  { %v1021_v41 = vadd.f32 %v1020_v36, %v1019_v35 }
 0x384   :  { %v1022_v49 = vrot.slane %v1021_v41, 1 }
 0x386   :  { %v1023_v42 = vadd.f32 %v1022_v49, %v1021_v41 }
 0x388   :  { %1815 = vmatmul.mubr.f32.vlgmr.msra.gmra.mrb[4].mxu0 %v1023_v42 }
 0x389   :  { %2118 = vmatpush3.bf16.msra.mxu0 %v2267_v24  ;;  %1849 = vmatprep.mubr.msk.f32.mxu0 %vm2165_vm6, %v2166_v13  ;;  %v1033_v24 = vrot.slane %v1032_v46, 2 }
 0x38a   :  { %2119 = vmatprep.subr.bf16.mxu0 %v2164_v3 }
 0x38d   :  { %2121 = vmatpush3.bf16.msra.mxu0 %v2276_v27  ;;  %v1034_v27 = vadd.f32 %v1033_v24, %v1032_v46 }
 0x38e   :  { %2122 = vmatprep.subr.bf16.mxu0 %v2164_v3 }
 0x391   :  { %2124 = vmatpush3.bf16.msra.mxu0 %v2292_v34  ;;  %v1035_v34 = vrot.slane %v1034_v27, 1 }
 0x392   :  { %2125 = vmatprep.subr.bf16.mxu0 %v2164_v3 }
 0x395   :  { %2127 = vmatpush3.bf16.msra.mxu0 %v2480_v62  ;;  %v1036_v62 = vadd.f32 %v1035_v34, %v1034_v27 }
 0x396   :  { %2128 = vmatprep.subr.bf16.mxu0 %v2164_v3 }
 0x399   :  { %2130 = vmatpush3.bf16.msra.mxu0 %v2492_v1 }
 0x39a   :  { %2131 = vmatprep.subr.bf16.mxu0 %v2164_v3 }
 0x39d   :  { %2133 = vmatpush3.bf16.msra.mxu0 %v2504_v5 }
 0x39e   :  { %2134 = vmatprep.subr.bf16.mxu0 %v2164_v3 }
 0x3a1   :  { %2136 = vmatpush3.bf16.msra.mxu0 %v2516_v8  ;;  %v1181_v8 = vld [vmem:[%s2822_s6] sm:$0x1] }
 0x3a2   :  { %2137 = vmatprep.subr.bf16.mxu0 %v2164_v3 }
 0x3a5   :  { %2139 = vmatpush3.bf16.msra.mxu0 %v2527_v12  ;;  %v1185_v12 = vld [vmem:[%s2823_s7] sm:$0x1] }
 0x3a8   :  { %1850 = vmatmul.mubr.f32.vlgmr.msra.gmra.mrb[6].mxu0 %v1036_v62 }
 0x45b   :  { %v1103_v13 = vpop.f32.mrb[4].mxu0 }
 0x45c   :  { %v1816_v48 = vpop.f32.mrb[5].mxu0  ;;  %v1177_v1 = vmul.f32 0.001953125, %v1103_v13 }
 0x45e   :  { %v1179_v51 = vmul.f32 %v1177_v1, %v1177_v1 }
 0x47b   :  { %v1173_v50 = vpop.f32.mrb[6].mxu0 }
 0x47c   :  { %v1178_v52 = vmul.f32 0.001953125, %v1173_v50  ;;  %v1851_v54 = vpop.f32.mrb[7].mxu0 }
 0x47e   :  { %v1180_v5 = vsub.f32 %v1178_v52, %v1179_v51 }
 0x480   :  { %v1182_v55 = vadd.f32 1e-05, %v1180_v5 }
 0x482   :  { %2161 = vrsqrt.f32 %v1182_v55 }
 0x48c   :  { %v2162_v3 = vpop.eup %2161 }
 0x48d   :  { %v1184_v56 = vmul.f32 %v2162_v3, %v1181_v8 }
 0x48f   :  { %v1186_v58 = vmul.f32 %v1184_v56, %v1177_v1  ;;  %v1192_v59 = vrot.slane %v1184_v56, %v2633_v39 }
 0x491   :  { %v1187_v60 = vsub.f32 %v1185_v12, %v1186_v58  ;;  %v1194_v61 = vmul.f32 %v1192_v59, %v992_v26  ;;  %v1195_v17 = vmul.f32 %v2767_v23, %v1192_v59  ;;  %v1196_v63 = vmul.f32 %v1192_v59, %v1002_v32 }
 0x492   :  { %v1197_v15 = vmul.f32 %v1781_v31, %v1192_v59 }
 0x493   :  { %v1202_v0 = vrot.slane %v1187_v60, %v2633_v39 }
 0x495   :  { %v1204_v22 = vadd.f32 %v1202_v0, %v1194_v61  ;;  %v1205_v14 = vadd.f32 %v1202_v0, %v1195_v17  ;;  %v1206_v2 = vadd.f32 %v1202_v0, %v1196_v63  ;;  %v1207_v21 = vadd.f32 %v1202_v0, %v1197_v15 }
 0x497   :  { %v1208_v6 = vadd.f32 %v2163_v4, %v1204_v22  ;;  %v1209_v7 = vadd.f32 %v1205_v14, %v2320_v44  ;;  %v1210_v9 = vadd.f32 %v1206_v2, %v2326_v47  ;;  %v1211_v11 = vadd.f32 %v1207_v21, %v2315_v43 }
 0x499   :  { %v1212_v16 = vmax.f32 %v1208_v6, 0.0  ;;  %v1213_v18 = vmax.f32 %v1209_v7, 0.0  ;;  %v1214_v19 = vmax.f32 %v1210_v9, 0.0  ;;  %v1215_v20 = vmax.f32 %v1211_v11, 0.0 }
 0x49b   :  { %1216 = vst [vmem:[%s2824_s8] sm:$0xff] %v1212_v16  ;;  %1217 = vst [vmem:[%s2824_s8 + $0x8] sm:$0xff] %v1213_v18 }
 0x49c   :  { %1218 = vst [vmem:[%s2824_s8 + $0x10] sm:$0xff] %v1214_v19  ;;  %1219 = vst [vmem:[%s2824_s8 + $0x18] sm:$0xff] %v1215_v20 }

</bundles_post_ra>
